<compile_context>
chip_gen: v5e
topology: v5e:2x2
jax: 0.10.0
libtpu: 0.0.40
codegen_flags: <defaults>
</compile_context>

<pallas_src>
import functools

import jax
import jax.numpy as jnp
from jax.experimental import pallas as pl
from jax.experimental.pallas import tpu as pltpu


def _round_up(x: int, m: int) -> int:
    return ((x + m - 1) // m) * m


def _gap_kernel_single(x_ref, o_ref, *, hw: int, tk: int):
    """Single-K-tile path. x_ref: (TM, TK); o_ref: (TM, 1)."""
    x = x_ref[...]
    if hw % tk != 0:
        col = jax.lax.broadcasted_iota(jnp.int32, x.shape, 1)
        x = jnp.where(col < hw, x, jnp.zeros_like(x))
    s = jnp.sum(x, axis=-1, keepdims=True, dtype=jnp.float32)
    o_ref[...] = (s * (1.0 / hw)).astype(o_ref.dtype)


def _gap_kernel_multi(x_ref, o_ref, acc_ref, *, hw: int, tk: int):
    """Multi-K-tile path. x_ref: (TM, TK); o_ref: (TM, 1); acc_ref: (TM, 1) f32."""
    k = pl.program_id(1)
    nk = pl.num_programs(1)

    @pl.when(k == 0)
    def _init():
        acc_ref[...] = jnp.zeros_like(acc_ref)

    x = x_ref[...]
    if hw % tk != 0:
        # Mask out-of-range columns of the (padded) last K tile.
        col = jax.lax.broadcasted_iota(jnp.int32, x.shape, 1) + k * tk
        x = jnp.where(col < hw, x, jnp.zeros_like(x))

    # Partial row sums for this K tile, accumulated in f32 (only a (TM, 1)
    # partial lives in scratch; no full-tile f32 copy is materialized).
    acc_ref[...] += jnp.sum(x, axis=-1, keepdims=True, dtype=jnp.float32)

    @pl.when(k == nk - 1)
    def _finalize():
        o_ref[...] = (acc_ref[...] * (1.0 / hw)).astype(o_ref.dtype)


def _choose_tiles(nc: int, hw: int, itemsize: int):
    # Lane (reduction) axis: multiple of 128, capped at 2048.
    tk = min(_round_up(hw, 128), 2048)
    # Row axis: multiple of 8; cap each input block at ~4 MiB so the
    # double-buffered pipeline fits v5e/v6e/v7x scoped VMEM with headroom.
    max_block_bytes = 4 * 1024 * 1024
    tm_cap = max(8, (max_block_bytes // (tk * itemsize)) // 8 * 8)
    tm = min(_round_up(nc, 8), tm_cap, 2048)
    return tm, tk


def global_avg_pool2d(x, dim=(2, 3), keepdim: bool = False):
    """Equivalent of GlobalAvgPool2d(dim=(2, 3), keepdim)(x) for NCHW input."""
    assert tuple(dim) == (2, 3), "kernel implements spatial (H, W) reduction"
    N, C, H, W = x.shape
    nc, hw = N * C, H * W
    itemsize = jnp.dtype(x.dtype).itemsize

    x2 = x.reshape(nc, hw)  # metadata-only for contiguous NCHW
    tm, tk = _choose_tiles(nc, hw, itemsize)
    nk = pl.cdiv(hw, tk)

    cost = pl.CostEstimate(
        flops=nc * hw,
        transcendentals=0,
        bytes_accessed=nc * hw * itemsize + nc * itemsize,
    )

    if nk == 1:
        # Fast path: whole H*W row fits one lane tile — pure row-parallel grid.
        kernel = functools.partial(_gap_kernel_single, hw=hw, tk=tk)
        out = pl.pallas_call(
            kernel,
            out_shape=jax.ShapeDtypeStruct((nc, 1), x.dtype),
            grid_spec=pltpu.PrefetchScalarGridSpec(
                num_scalar_prefetch=0,
                grid=(pl.cdiv(nc, tm),),
                in_specs=[pl.BlockSpec((tm, tk), lambda i: (i, 0))],
                out_specs=pl.BlockSpec((tm, 1), lambda i: (i, 0)),
            ),
            compiler_params=pltpu.CompilerParams(
                dimension_semantics=("parallel",),
                vmem_limit_bytes=32 << 20,
            ),
            cost_estimate=cost,
        )(x2)
    else:
        # General path: reduction axis last ("arbitrary"), f32 accumulator.
        kernel = functools.partial(_gap_kernel_multi, hw=hw, tk=tk)
        out = pl.pallas_call(
            kernel,
            out_shape=jax.ShapeDtypeStruct((nc, 1), x.dtype),
            grid_spec=pltpu.PrefetchScalarGridSpec(
                num_scalar_prefetch=0,
                grid=(pl.cdiv(nc, tm), nk),
                in_specs=[pl.BlockSpec((tm, tk), lambda i, k: (i, k))],
                out_specs=pl.BlockSpec((tm, 1), lambda i, k: (i, 0)),
                scratch_shapes=[pltpu.VMEM((tm, 1), jnp.float32)],
            ),
            compiler_params=pltpu.CompilerParams(
                dimension_semantics=("parallel", "arbitrary"),
                vmem_limit_bytes=32 << 20,
            ),
            cost_estimate=cost,
        )(x2)

    out = out.reshape(N, C)
    if keepdim:
        out = out.reshape(N, C, 1, 1)
    return out


if __name__ == "__main__":
    key = jax.random.PRNGKey(0)

    # Module instance semantics: GlobalAvgPool2d(dim=(2, 3), keepdim=False)
    x = jax.random.normal(key, (2, 4, 16, 16), dtype=jnp.float32)
    y = jax.block_until_ready(global_avg_pool2d(x, dim=(2, 3), keepdim=False))
    y_ref = jnp.mean(x, axis=(2, 3))
    assert y.shape == (2, 4)
    assert jnp.allclose(y, y_ref, atol=1e-5, rtol=1e-5)

    # Ragged H*W (mask path) and keepdim=True.
    x2 = jax.random.normal(jax.random.PRNGKey(0), (2, 4, 7, 7), dtype=jnp.float32)
    y2 = jax.block_until_ready(global_avg_pool2d(x2, dim=(2, 3), keepdim=True))
    y2_ref = jnp.mean(x2, axis=(2, 3), keepdims=True)
    assert y2.shape == (2, 4, 1, 1)
    assert jnp.allclose(y2, y2_ref, atol=1e-5, rtol=1e-5)

    # Multi-K-tile accumulator path (H*W > 2048) with ragged tail.
    x3 = jax.random.normal(jax.random.PRNGKey(0), (2, 4, 48, 48), dtype=jnp.float32)
    y3 = jax.block_until_ready(global_avg_pool2d(x3, dim=(2, 3), keepdim=False))
    y3_ref = jnp.mean(x3, axis=(2, 3))
    assert y3.shape == (2, 4)
    assert jnp.allclose(y3, y3_ref, atol=1e-5, rtol=1e-5)

    print("KERNEL_OK")
</pallas_src>

<mosaic_0001>
module attributes {stable_mosaic.version = 11 : i64} {
  func.func @_gap_kernel_single(%arg0: i32, %arg1: memref<8x256xf32, #tpu.memory_space<vmem>>, %arg2: memref<8x1xf32, #tpu.memory_space<vmem>>) attributes {dimension_semantics = [#tpu.dimension_semantics<parallel>], iteration_bounds = array<i64: 1>, scalar_prefetch = 0 : i64, scratch_operands = 0 : i64, tpu.core_type = #tpu.core_type<tc>, window_params = [{transform_indices = @transform_0, window_bounds = array<i64: 8, 256>}, {transform_indices = @transform_1, window_bounds = array<i64: 8, 1>}]} {
    %c0 = arith.constant 0 : index
    %c0_0 = arith.constant 0 : index
    %0 = vector.load %arg1[%c0, %c0_0] : memref<8x256xf32, #tpu.memory_space<vmem>>, vector<8x256xf32>
    %cst = arith.constant dense<0.000000e+00> : vector<8xf32>
    %1 = vector.multi_reduction <add>, %0, %cst [1] : vector<8x256xf32> to vector<8xf32>
    %2 = vector.shape_cast %1 : vector<8xf32> to vector<8x1xf32>
    %cst_1 = arith.constant 3.906250e-03 : f32
    %3 = vector.broadcast %cst_1 : f32 to vector<8x1xf32>
    %4 = arith.mulf %2, %3 : vector<8x1xf32>
    %c0_2 = arith.constant 0 : index
    %c0_3 = arith.constant 0 : index
    %5 = vector.load %arg2[%c0_2, %c0_3] : memref<8x1xf32, #tpu.memory_space<vmem>>, vector<8x1xf32>
    tpu.vector_store %arg2[%c0_2, %c0_3], %4 {strides = array<i32>} : memref<8x1xf32, #tpu.memory_space<vmem>>, vector<8x1xf32>,
    return
  }
  func.func @transform_0(%arg0: i32) -> (i32, i32) {
    %c0_i32 = arith.constant 0 : i32
    %c0_i32_0 = arith.constant 0 : i32
    return %arg0, %c0_i32 : i32, i32
  }
  func.func @transform_1(%arg0: i32) -> (i32, i32) {
    %c0_i32 = arith.constant 0 : i32
    %c0_i32_0 = arith.constant 0 : i32
    return %arg0, %c0_i32 : i32, i32
  }
}

</mosaic_0001>

<bundles_post_ra>
// kernel: tpu_custom_call.1
= control target key start
LH: loop header
LB: loop body
LE: loop exit
PB: predicated region body
PF: predicated region fallthrough
CT: control target
= control target key end

     0   :  { %6 = vsyncpa [#allocation3], 0  ;;  %s62_s9 = smov [#allocation2]   ;;  %s79_s0 = inlined_call_operand.hbm [shape: f32[8,256], index: 0, kind: input, shape index: {}]   ;;  %s80_s1 = inlined_call_operand.vmem [shape: f32[8,1], index: 1, kind: output, shape index: {}]  }
   0x1   :  { %s12_s8 = sshll.u32 %s79_s0, 4  ;;  %s14_s10 = sshll.u32 %s62_s9, 4  ;;  %s13_s8 = int_to_ptr.hbm [resolvable:$true] %s12_s8  ;;  %s15_s10 = int_to_ptr.vmem [resolvable:$true] %s14_s10 }
   0x2   :  { %17 = dma.hbm_to_vmem [thread:$0]  %s13_s8, 256, %s15_s10, [#allocation3]  }
   0x3   :  { %60 = dma.done.wait [#allocation3], 256  }
   0x4   :  { %61 = vsyncadd [#allocation3], 4294967040  ;;  %v22_v0 = vld [vmem:[#allocation2] sm:$0xff]  ;;  %v23_v1 = vld [vmem:[#allocation2 + $0x8] sm:$0xff]  ;;  %vm28_vm0 = vcmask 7168  }
   0x5   :  { %v24_v2 = vadd.f32 %v23_v1, %v22_v0 }
   0x7   :  { %25 = vadd.xlane.f32.xlu0 %v24_v2 }
  0x7a   :  { %v26_v3 = vpop.xlane.xlu0 %25 }
  0x7b   :  { %v27_v4 = vmul.f32 0.00390625, %v26_v3 }
  0x7d   :  { %29 = vst.msk [vmem:[%s80_s1] sm:$0xff] %vm28_vm0, %v27_v4 }
  0x7e   :  { %34 = vsyncpa [#allocation3], 1 }

</bundles_post_ra>
